<compile_context>
chip_gen: v5e
topology: v5e:2x2
jax: 0.10.0
libtpu: 0.0.40
codegen_flags: <defaults>
</compile_context>

<pallas_src>
import functools

import numpy as np

import jax
import jax.numpy as jnp
from jax.experimental import pallas as pl
from jax.experimental.pallas import tpu as pltpu


# --------------------------------------------------------------------------- #
# Weight-slab packing (one DMA instead of six)                                 #
# --------------------------------------------------------------------------- #
def _rup8(v):
    return -(-v // 8) * 8


def _slab_layout(c, dmid, dout, cout):
    """Row offsets of each parameter inside the packed (rows, lanes) f32 slab.

    Every segment starts on an 8-row (sublane) boundary so in-kernel static slices
    never cross a tile boundary.
    """
    lanes = max(dmid, dout, cout)
    o_w1 = 0
    o_w2 = o_w1 + _rup8(c)
    o_fcw = o_w2 + _rup8(dmid)
    o_b1 = o_fcw + _rup8(dout)
    o_b2 = o_b1 + 8
    o_fcb = o_b2 + 8
    rows = o_fcb + 8
    return dict(w1=o_w1, w2=o_w2, fcw=o_fcw, b1=o_b1, b2=o_b2, fcb=o_fcb,
                rows=rows, lanes=lanes)


def _pack_weight_slab(w1, b1, w2, b2, fcw, fcb):
    c, dmid = w1.shape
    dout = w2.shape[1]
    cout = fcw.shape[1]
    lay = _slab_layout(c, dmid, dout, cout)
    slab = jnp.zeros((lay["rows"], lay["lanes"]), jnp.float32)
    slab = slab.at[lay["w1"]:lay["w1"] + c, :dmid].set(w1)
    slab = slab.at[lay["w2"]:lay["w2"] + dmid, :dout].set(w2)
    slab = slab.at[lay["fcw"]:lay["fcw"] + dout, :cout].set(fcw)
    slab = slab.at[lay["b1"]:lay["b1"] + 1, :dmid].set(b1)
    slab = slab.at[lay["b2"]:lay["b2"] + 1, :dout].set(b2)
    slab = slab.at[lay["fcb"]:lay["fcb"] + 1, :cout].set(fcb)
    return slab


# --------------------------------------------------------------------------- #
# Pooling matrix (built once with NumPy, hoisted out of the jitted forward)    #
# --------------------------------------------------------------------------- #
@functools.lru_cache(maxsize=None)
def _window_pool_matrix(n, num_windows, window_len):
    # (N*W, N*L) block-diagonal window-averaging matrix; row n*W + w averages
    # x_flat rows [n*L + w*window_len, n*L + (w+1)*window_len).
    return np.kron(np.eye(n * num_windows, dtype=np.float32),
                   np.full((1, window_len), 1.0 / window_len, dtype=np.float32))


# --------------------------------------------------------------------------- #
# Fused kernel: pool -> Linear -> ReLU -> Linear -> mean -> fc                 #
# --------------------------------------------------------------------------- #
def bolt_fused(x_flat, pool, wslab, *, batch, num_windows, channels,
               dmid, dout, cout):
    """x_flat: (N*L, C) time-major; pool: (N*W, N*L); wslab: packed weights.

    Returns (yhat (N, cout), proj (N, W, dout)).
    """
    n, w, c = batch, num_windows, channels
    nl = x_flat.shape[0]
    nw = n * w
    lay = _slab_layout(c, dmid, dout, cout)
    lanes = lay["lanes"]

    def kernel(x_ref, p_ref, w_ref, proj_ref, yhat_ref):
        # Window-mean pooling for ALL batches in one MXU pass:
        # (N*W, N*L) x (N*L, C) -> (N*W, C). No in-kernel transpose needed.
        cls = jnp.dot(p_ref[...], x_ref[...], preferred_element_type=jnp.float32)

        # Static, 8-row-aligned views into the single packed weight slab.
        w1 = w_ref[lay["w1"]:lay["w1"] + c, :dmid]
        b1 = w_ref[lay["b1"]:lay["b1"] + 1, :dmid]
        w2 = w_ref[lay["w2"]:lay["w2"] + dmid, :dout]
        b2 = w_ref[lay["b2"]:lay["b2"] + 1, :dout]
        fcw = w_ref[lay["fcw"]:lay["fcw"] + dout, :]   # (dout, lanes); cols >= cout are 0
        fcb = w_ref[lay["fcb"]:lay["fcb"] + 1, :]

        # cs_proj (count_of_layers == 2): Linear -> ReLU -> Linear, f32 accumulate.
        h = jnp.maximum(jnp.dot(cls, w1, preferred_element_type=jnp.float32) + b1, 0.0)
        proj = jnp.dot(h, w2, preferred_element_type=jnp.float32) + b2   # (N*W, dout)
        proj_ref[...] = proj.astype(proj_ref.dtype)                       # single store

        # Head: fc(mean(proj, dim=window)); single (N, cout) store.
        pooled = jnp.mean(proj.reshape(n, w, dout), axis=1)               # (N, dout)
        y = jnp.dot(pooled, fcw, preferred_element_type=jnp.float32) + fcb
        yhat_ref[...] = y[:, :cout].astype(yhat_ref.dtype)

    flops = 2 * (nw * nl * c + nw * c * dmid + nw * dmid * dout + n * dout * lanes)
    bytes_accessed = 4 * (x_flat.size + pool.size + wslab.size + nw * dout + n * cout)

    proj_flat, yhat = pl.pallas_call(
        kernel,
        out_shape=(
            jax.ShapeDtypeStruct((nw, dout), x_flat.dtype),
            jax.ShapeDtypeStruct((n, cout), x_flat.dtype),
        ),
        grid_spec=pltpu.PrefetchScalarGridSpec(
            num_scalar_prefetch=0,
            grid=(1,),                                      # whole batch in one step
            in_specs=[
                pl.BlockSpec((nl, c), lambda i: (0, 0)),            # activations
                pl.BlockSpec((nw, nl), lambda i: (0, 0)),           # pooling matrix
                pl.BlockSpec((lay["rows"], lanes), lambda i: (0, 0)),  # packed weights
            ],
            out_specs=(
                pl.BlockSpec((nw, dout), lambda i: (0, 0)),
                pl.BlockSpec((n, cout), lambda i: (0, 0)),
            ),
        ),
        compiler_params=pltpu.CompilerParams(
            dimension_semantics=("arbitrary",)),
        cost_estimate=pl.CostEstimate(flops=flops, transcendentals=0,
                                      bytes_accessed=bytes_accessed),
    )(x_flat, pool, wslab)
    return yhat, proj_flat.reshape(n, w, dout)


# --------------------------------------------------------------------------- #
# Parameters (deterministic, mirroring BolTProxy.__init__ shapes)              #
# --------------------------------------------------------------------------- #
def _linear_init(key, din, dout):
    kw, kb = jax.random.split(key)
    bound = din ** -0.5
    w = jax.random.uniform(kw, (din, dout), jnp.float32, -bound, bound)
    b = jax.random.uniform(kb, (1, dout), jnp.float32, -bound, bound)
    return w, b


def init_params(key, *, dim=32, dim1=32, dim2=32, state_count=4):
    ks = jax.random.split(key, 8)
    params = {
        # defined in __init__ but unused by forward(); created for fidelity
        "state_feature": jax.random.normal(ks[0], (1, dim, state_count), jnp.float32),
        "entropy_alpha": jnp.zeros((1,), jnp.float32),
        "entropy_beta": jnp.zeros((1,), jnp.float32),
        "w1": jnp.ones((1,), jnp.float32),
        # cls_win_proj{1,2} with count_of_layers=2: Linear -> ReLU -> Linear
        "cs_proj1": (*_linear_init(ks[1], dim1, dim1), *_linear_init(ks[2], dim1, dim1)),
        "cs_proj2": (*_linear_init(ks[3], dim2, dim2), *_linear_init(ks[4], dim2, dim2)),
        "fc": _linear_init(ks[5], dim1 + dim2, 2),
        "fc1": _linear_init(ks[6], dim1, 2),
        "fc2": _linear_init(ks[7], dim2, 2),
    }
    # Pre-packed single-DMA weight slabs (built once, outside any jit).
    params["wslab1"] = _pack_weight_slab(*params["cs_proj1"], *params["fc1"])
    params["wslab2"] = _pack_weight_slab(*params["cs_proj2"], *params["fc2"])
    return params


# --------------------------------------------------------------------------- #
# Forward                                                                      #
# --------------------------------------------------------------------------- #
def bolt_proxy_forward(params, ts, *, atlas=1, window_len=16):
    N, C, L = ts.shape
    assert L % window_len == 0, "time length must be a multiple of window_len"
    W = L // window_len

    # forward(): rearrange 'n c l -> n l c' (Identity atlas embedding), flattened to
    # (N*L, C) so the kernel's pooling matmul needs no in-kernel transpose.
    x_flat = jnp.swapaxes(ts, 1, 2).reshape(N * L, C)
    pool = jnp.asarray(_window_pool_matrix(N, W, window_len), dtype=ts.dtype)

    if atlas == 1:
        w1, _, w2, _ = params["cs_proj1"]
        fcw, _ = params["fc1"]
        slab = params["wslab1"]
    else:
        w1, _, w2, _ = params["cs_proj2"]
        fcw, _ = params["fc2"]
        slab = params["wslab2"]
    assert w1.shape[0] == C, "channel count must match the selected cs_proj input dim"

    yhat, proj = bolt_fused(
        x_flat, pool, slab,
        batch=N, num_windows=W, channels=C,
        dmid=w1.shape[1], dout=w2.shape[1], cout=fcw.shape[1])
    return yhat, proj


if __name__ == "__main__":
    key = jax.random.PRNGKey(0)
    pkey, xkey = jax.random.split(key)

    DIM1 = 32   # hyperParams.dim1 (= ROI channel count for atlas 1)
    WINDOW = 16
    params = init_params(pkey, dim=DIM1, dim1=DIM1, dim2=DIM1, state_count=4)

    # ts: (N, C, L) = (batch, ROI-channels, time), PyTorch 'n c l'
    ts = jax.random.normal(xkey, (2, DIM1, 128), jnp.float32)

    fwd = jax.jit(functools.partial(bolt_proxy_forward, atlas=1, window_len=WINDOW))
    yhat, proj = fwd(params, ts)
    jax.block_until_ready((yhat, proj))

    assert yhat.shape == (2, 2) and proj.shape == (2, 128 // WINDOW, DIM1)

    # Pure-JAX reference of the fused path (pool -> MLP -> mean -> fc).
    cls_ref = jnp.transpose(
        ts.reshape(2, DIM1, 128 // WINDOW, WINDOW).mean(axis=-1), (0, 2, 1))
    w1r, b1r, w2r, b2r = params["cs_proj1"]
    fcwr, fcbr = params["fc1"]
    proj_ref = jnp.maximum(cls_ref @ w1r + b1r, 0.0) @ w2r + b2r
    yhat_ref = proj_ref.mean(axis=1) @ fcwr + fcbr
    assert jnp.allclose(proj, proj_ref, atol=1e-4), "proj mismatch vs reference"
    assert jnp.allclose(yhat, yhat_ref, atol=1e-4), "yhat mismatch vs reference"

    print("KERNEL_OK")
</pallas_src>

<mosaic_0001>
module attributes {stable_mosaic.version = 11 : i64} {
  func.func @kernel(%arg0: i32, %arg1: memref<256x32xf32, #tpu.memory_space<vmem>>, %arg2: memref<16x256xf32, #tpu.memory_space<vmem>>, %arg3: memref<120x32xf32, #tpu.memory_space<vmem>>, %arg4: memref<16x32xf32, #tpu.memory_space<vmem>>, %arg5: memref<2x2xf32, #tpu.memory_space<vmem>>) attributes {dimension_semantics = [#tpu.dimension_semantics<arbitrary>], iteration_bounds = array<i64: 1>, scalar_prefetch = 0 : i64, scratch_operands = 0 : i64, tpu.core_type = #tpu.core_type<tc>, window_params = [{pipeline_mode = #tpu.pipeline_mode<synchronous>, transform_indices = @transform_0, window_bounds = array<i64: 256, 32>}, {pipeline_mode = #tpu.pipeline_mode<synchronous>, transform_indices = @transform_1, window_bounds = array<i64: 16, 256>}, {pipeline_mode = #tpu.pipeline_mode<synchronous>, transform_indices = @transform_2, window_bounds = array<i64: 120, 32>}, {pipeline_mode = #tpu.pipeline_mode<synchronous>, transform_indices = @transform_3, window_bounds = array<i64: 16, 32>}, {pipeline_mode = #tpu.pipeline_mode<synchronous>, transform_indices = @transform_4, window_bounds = array<i64: 2, 2>}]} {
    %c0 = arith.constant 0 : index
    %c0_0 = arith.constant 0 : index
    %0 = vector.load %arg2[%c0, %c0_0] : memref<16x256xf32, #tpu.memory_space<vmem>>, vector<16x256xf32>
    %c0_1 = arith.constant 0 : index
    %c0_2 = arith.constant 0 : index
    %1 = vector.load %arg1[%c0_1, %c0_2] : memref<256x32xf32, #tpu.memory_space<vmem>>, vector<256x32xf32>
    %cst = arith.constant dense<0.000000e+00> : vector<16x32xf32>
    %2 = tpu.matmul %0, %1, %cst {dimension_numbers = #tpu.dot_dimension_numbers<[1], [0], [0], [1], [0, 0, 1, 1], [], []>} : vector<16x256xf32>, vector<256x32xf32>, vector<16x32xf32> -> vector<16x32xf32>
    %c0_3 = arith.constant 0 : index
    %c0_4 = arith.constant 0 : index
    %3 = vector.load %arg3[%c0_3, %c0_4] : memref<120x32xf32, #tpu.memory_space<vmem>>, vector<32x32xf32>
    %c96 = arith.constant 96 : index
    %c0_5 = arith.constant 0 : index
    %4 = vector.load %arg3[%c96, %c0_5] : memref<120x32xf32, #tpu.memory_space<vmem>>, vector<1x32xf32>
    %c32 = arith.constant 32 : index
    %c0_6 = arith.constant 0 : index
    %5 = vector.load %arg3[%c32, %c0_6] : memref<120x32xf32, #tpu.memory_space<vmem>>, vector<32x32xf32>
    %c104 = arith.constant 104 : index
    %c0_7 = arith.constant 0 : index
    %6 = vector.load %arg3[%c104, %c0_7] : memref<120x32xf32, #tpu.memory_space<vmem>>, vector<1x32xf32>
    %c64 = arith.constant 64 : index
    %c0_8 = arith.constant 0 : index
    %7 = vector.load %arg3[%c64, %c0_8] : memref<120x32xf32, #tpu.memory_space<vmem>>, vector<32x32xf32>
    %c112 = arith.constant 112 : index
    %c0_9 = arith.constant 0 : index
    %8 = vector.load %arg3[%c112, %c0_9] : memref<120x32xf32, #tpu.memory_space<vmem>>, vector<1x32xf32>
    %cst_10 = arith.constant dense<0.000000e+00> : vector<16x32xf32>
    %9 = tpu.matmul %2, %3, %cst_10 {dimension_numbers = #tpu.dot_dimension_numbers<[1], [0], [0], [1], [0, 0, 1, 1], [], []>} : vector<16x32xf32>, vector<32x32xf32>, vector<16x32xf32> -> vector<16x32xf32>
    %10 = vector.broadcast %4 : vector<1x32xf32> to vector<16x32xf32>
    %11 = arith.addf %9, %10 : vector<16x32xf32>
    %cst_11 = arith.constant 0.000000e+00 : f32
    %12 = vector.broadcast %cst_11 : f32 to vector<16x32xf32>
    %13 = arith.maximumf %11, %12 : vector<16x32xf32>
    %cst_12 = arith.constant dense<0.000000e+00> : vector<16x32xf32>
    %14 = tpu.matmul %13, %5, %cst_12 {dimension_numbers = #tpu.dot_dimension_numbers<[1], [0], [0], [1], [0, 0, 1, 1], [], []>} : vector<16x32xf32>, vector<32x32xf32>, vector<16x32xf32> -> vector<16x32xf32>
    %15 = vector.broadcast %6 : vector<1x32xf32> to vector<16x32xf32>
    %16 = arith.addf %14, %15 : vector<16x32xf32>
    %c0_13 = arith.constant 0 : index
    %c0_14 = arith.constant 0 : index
    %17 = vector.load %arg4[%c0_13, %c0_14] : memref<16x32xf32, #tpu.memory_space<vmem>>, vector<16x32xf32>
    tpu.vector_store %arg4[%c0_13, %c0_14], %16 {strides = array<i32>} : memref<16x32xf32, #tpu.memory_space<vmem>>, vector<16x32xf32>,
    %18 = vector.shape_cast %16 : vector<16x32xf32> to vector<2x8x32xf32>
    %cst_15 = arith.constant dense<0.000000e+00> : vector<2x32xf32>
    %19 = vector.multi_reduction <add>, %18, %cst_15 [1] : vector<2x8x32xf32> to vector<2x32xf32>
    %cst_16 = arith.constant 8.000000e+00 : f32
    %20 = vector.broadcast %cst_16 : f32 to vector<2x32xf32>
    %21 = arith.divf %19, %20 : vector<2x32xf32>
    %cst_17 = arith.constant dense<0.000000e+00> : vector<2x32xf32>
    %22 = tpu.matmul %21, %7, %cst_17 {dimension_numbers = #tpu.dot_dimension_numbers<[1], [0], [0], [1], [0, 0, 1, 1], [], []>} : vector<2x32xf32>, vector<32x32xf32>, vector<2x32xf32> -> vector<2x32xf32>
    %23 = vector.broadcast %8 : vector<1x32xf32> to vector<2x32xf32>
    %24 = arith.addf %22, %23 : vector<2x32xf32>
    %25 = vector.extract_strided_slice %24 {offsets = [0, 0], sizes = [2, 2], strides = [1, 1]} : vector<2x32xf32> to vector<2x2xf32>
    %c0_18 = arith.constant 0 : index
    %c0_19 = arith.constant 0 : index
    %26 = vector.load %arg5[%c0_18, %c0_19] : memref<2x2xf32, #tpu.memory_space<vmem>>, vector<2x2xf32>
    tpu.vector_store %arg5[%c0_18, %c0_19], %25 {strides = array<i32>} : memref<2x2xf32, #tpu.memory_space<vmem>>, vector<2x2xf32>,
    return
  }
  func.func @transform_0(%arg0: i32) -> (i32, i32) {
    %c0_i32 = arith.constant 0 : i32
    %c0_i32_0 = arith.constant 0 : i32
    %c0_i32_1 = arith.constant 0 : i32
    return %c0_i32, %c0_i32_0 : i32, i32
  }
  func.func @transform_1(%arg0: i32) -> (i32, i32) {
    %c0_i32 = arith.constant 0 : i32
    %c0_i32_0 = arith.constant 0 : i32
    %c0_i32_1 = arith.constant 0 : i32
    return %c0_i32, %c0_i32_0 : i32, i32
  }
  func.func @transform_2(%arg0: i32) -> (i32, i32) {
    %c0_i32 = arith.constant 0 : i32
    %c0_i32_0 = arith.constant 0 : i32
    %c0_i32_1 = arith.constant 0 : i32
    return %c0_i32, %c0_i32_0 : i32, i32
  }
  func.func @transform_3(%arg0: i32) -> (i32, i32) {
    %c0_i32 = arith.constant 0 : i32
    %c0_i32_0 = arith.constant 0 : i32
    %c0_i32_1 = arith.constant 0 : i32
    return %c0_i32, %c0_i32_0 : i32, i32
  }
  func.func @transform_4(%arg0: i32) -> (i32, i32) {
    %c0_i32 = arith.constant 0 : i32
    %c0_i32_0 = arith.constant 0 : i32
    %c0_i32_1 = arith.constant 0 : i32
    return %c0_i32, %c0_i32_0 : i32, i32
  }
}

</mosaic_0001>

<bundles_post_ra>
// kernel: bolt_proxy_forward.1
= control target key start
LH: loop header
LB: loop body
LE: loop exit
PB: predicated region body
PF: predicated region fallthrough
CT: control target
= control target key end

     0   :  { %10 = vsyncpa [#allocation3], 0  ;;  %s531_s0 = inlined_call_operand.vmem [shape: f32[256,32], index: 0, kind: input, shape index: {}]   ;;  %s532_s1 = inlined_call_operand.vmem [shape: f32[16,256], index: 1, kind: input, shape index: {}]   ;;  %s533_s2 = inlined_call_operand.vmem [shape: f32[120,32], index: 2, kind: input, shape index: {}]   ;;  %s534_s3 = inlined_call_operand.hbm [shape: f32[16,32], index: 3, kind: output, shape index: {0}]   ;;  %s535_s4 = inlined_call_operand.hbm [shape: f32[2,2], index: 4, kind: output, shape index: {1}]  }
   0x1   :  { %v37_v0 = vld [vmem:[%s531_s0 + $0x78] sm:$0xff]  ;;  %v36_v2 = vld [vmem:[%s531_s0 + $0x70] sm:$0xff]  ;;  %v35_v4 = vld [vmem:[%s531_s0 + $0x68] sm:$0xff] }
   0x2   :  { %v53_v1 = vld [vmem:[%s531_s0 + $0xf8] sm:$0xff]  ;;  %54 = vmatpush.msra.mxu0 %v37_v0  ;;  %v52_v3 = vld [vmem:[%s531_s0 + $0xf0] sm:$0xff]  ;;  %v51_v5 = vld [vmem:[%s531_s0 + $0xe8] sm:$0xff] }
   0x3   :  { %77 = vmatpush.msra.mxu1 %v53_v1  ;;  %v34_v6 = vld [vmem:[%s531_s0 + $0x60] sm:$0xff]  ;;  %v33_v8 = vld [vmem:[%s531_s0 + $0x58] sm:$0xff]  ;;  %v32_v10 = vld [vmem:[%s531_s0 + $0x50] sm:$0xff] }
   0x4   :  { %55 = vmatpush.msra.mxu0 %v36_v2  ;;  %v50_v7 = vld [vmem:[%s531_s0 + $0xe0] sm:$0xff]  ;;  %v49_v9 = vld [vmem:[%s531_s0 + $0xd8] sm:$0xff]  ;;  %v48_v11 = vld [vmem:[%s531_s0 + $0xd0] sm:$0xff] }
   0x5   :  { %78 = vmatpush.msra.mxu1 %v52_v3  ;;  %v31_v12 = vld [vmem:[%s531_s0 + $0x48] sm:$0xff]  ;;  %v30_v14 = vld [vmem:[%s531_s0 + $0x40] sm:$0xff]  ;;  %v103_v16 = vld [vmem:[%s533_s2 + $0x18] sm:$0xff] }
   0x6   :  { %56 = vmatpush.msra.mxu0 %v35_v4  ;;  %v47_v13 = vld [vmem:[%s531_s0 + $0xc8] sm:$0xff]  ;;  %v46_v15 = vld [vmem:[%s531_s0 + $0xc0] sm:$0xff]  ;;  %v102_v17 = vld [vmem:[%s533_s2 + $0x10] sm:$0xff] }
   0x7   :  { %79 = vmatpush.msra.mxu1 %v51_v5 }
   0x8   :  { %57 = vmatpush.msra.mxu0 %v34_v6 }
   0x9   :  { %80 = vmatpush.msra.mxu1 %v50_v7 }
   0xa   :  { %58 = vmatpush.msra.mxu0 %v33_v8 }
   0xb   :  { %81 = vmatpush.msra.mxu1 %v49_v9 }
   0xc   :  { %59 = vmatpush.msra.mxu0 %v32_v10 }
   0xd   :  { %82 = vmatpush.msra.mxu1 %v48_v11 }
   0xe   :  { %60 = vmatpush.msra.mxu0 %v31_v12 }
   0xf   :  { %83 = vmatpush.msra.mxu1 %v47_v13 }
  0x10   :  { %11 = vsyncpa [#allocation5], 0  ;;  %v29_v18 = vld [vmem:[%s531_s0 + $0x38] sm:$0xff]  ;;  %135 = vmatpush.msra.mxu2 %v103_v16  ;;  %61 = vmatpush.msra.mxu0 %v30_v14  ;;  %v28_v20 = vld [vmem:[%s531_s0 + $0x30] sm:$0xff]  ;;  %vm116_vm0 = vcmask 261120   ;;  %v333_v61 = vmov 8.0  }
  0x11   :  { %v45_v19 = vld [vmem:[%s531_s0 + $0xb8] sm:$0xff]  ;;  %84 = vmatpush.msra.mxu1 %v46_v15  ;;  %v44_v21 = vld [vmem:[%s531_s0 + $0xb0] sm:$0xff]  ;;  %v27_v22 = vld [vmem:[%s531_s0 + $0x28] sm:$0xff]  ;;  %279 = vrcp.f32 %v333_v61  ;;  %vm206_vm2 = vcmask 1041409   ;;  %s334_s9 = smov [#allocation2]   ;;  %s238_s12 = sshll.u32 %s534_s3, 4  ;;  %s239_s12 = int_to_ptr.hbm [resolvable:$true] %s238_s12 }
  0x12   :  { %136 = vmatpush.msra.mxu2 %v102_v17  ;;  %62 = vmatpush.msra.mxu0 %v29_v18  ;;  %v43_v23 = vld [vmem:[%s531_s0 + $0xa8] sm:$0xff]  ;;  %v26_v24 = vld [vmem:[%s531_s0 + $0x20] sm:$0xff]  ;;  %v25_v26 = vld [vmem:[%s531_s0 + $0x18] sm:$0xff]  ;;  %s236_s10 = sshll.u32 %s334_s9, 4  ;;  %s335_s13 = smov 128   ;;  %vm230_vm3 = vcmask 9216   ;;  %s237_s10 = int_to_ptr.vmem [resolvable:$true] %s236_s10 }
  0x13   :  { %85 = vmatpush.msra.mxu1 %v45_v19  ;;  %v42_v25 = vld [vmem:[%s531_s0 + $0xa0] sm:$0xff]  ;;  %v41_v27 = vld [vmem:[%s531_s0 + $0x98] sm:$0xff]  ;;  %v24_v28 = vld [vmem:[%s531_s0 + $0x10] sm:$0xff]  ;;  %s336_s14 = smov 8   ;;  %s337_s17 = smov [#allocation4]  }
  0x14   :  { %63 = vmatpush.msra.mxu0 %v28_v20  ;;  %v40_v29 = vld [vmem:[%s531_s0 + $0x90] sm:$0xff]  ;;  %v23_v30 = vld [vmem:[%s531_s0 + $0x8] sm:$0xff]  ;;  %v22_v32 = vld [vmem:[%s531_s0] sm:$0xff]  ;;  %s252_s20 = sshll.u32 %s535_s4, 4  ;;  %s253_s20 = int_to_ptr.hbm [resolvable:$true] %s252_s20 }
  0x15   :  { %86 = vmatpush.msra.mxu1 %v44_v21  ;;  %v39_v31 = vld [vmem:[%s531_s0 + $0x88] sm:$0xff]  ;;  %v38_v33 = vld [vmem:[%s531_s0 + $0x80] sm:$0xff]  ;;  %v20_v36 = vld [vmem:[%s532_s1 + $0x10] sm:$0xff] }
  0x16   :  { %64 = vmatpush.msra.mxu0 %v27_v22  ;;  %v18_v34 = vld [vmem:[%s532_s1] sm:$0xff]  ;;  %v19_v35 = vld [vmem:[%s532_s1 + $0x8] sm:$0xff]  ;;  %v21_v37 = vld [vmem:[%s532_s1 + $0x18] sm:$0xff]  ;;  %s250_s1 = sshll.u32 %s337_s17, 4  ;;  %s251_s1 = int_to_ptr.vmem [resolvable:$true] %s250_s1 }
  0x17   :  { %87 = vmatpush.msra.mxu1 %v43_v23  ;;  %v101_v38 = vld [vmem:[%s533_s2 + $0x8] sm:$0xff]  ;;  %v100_v39 = vld [vmem:[%s533_s2] sm:$0xff]  ;;  %v108_v40 = vld [vmem:[%s533_s2 + $0x38] sm:$0xff]  ;;  %v280_v1 = vpop.eup %279 }
  0x18   :  { %65 = vmatpush.msra.mxu0 %v26_v24  ;;  %137 = vmatpush.msra.mxu2 %v101_v38  ;;  %v107_v47 = vld [vmem:[%s533_s2 + $0x30] sm:$0xff]  ;;  %v106_v48 = vld [vmem:[%s533_s2 + $0x28] sm:$0xff]  ;;  %v105_v49 = vld [vmem:[%s533_s2 + $0x20] sm:$0xff]  ;;  %v195_v4 = vmul.f32 8.0, %v280_v1  ;;  %vm199_vm1 = vweird.f32 %v280_v1 }
  0x19   :  { %88 = vmatpush.msra.mxu1 %v42_v25  ;;  %167 = vmatpush.msra.mxu3 %v108_v40  ;;  %v276_v50 = vld [vmem:[%s533_s2 + $0x60] ss:$0 sm:$0xff]  ;;  %v113_v57 = vld [vmem:[%s533_s2 + $0x58] sm:$0xff]  ;;  %v112_v58 = vld [vmem:[%s533_s2 + $0x50] sm:$0xff] }
  0x1a   :  { %66 = vmatpush.msra.mxu0 %v25_v26  ;;  %138 = vmatpush.msra.mxu2 %v100_v39  ;;  %v111_v59 = vld [vmem:[%s533_s2 + $0x48] sm:$0xff]  ;;  %v110_v60 = vld [vmem:[%s533_s2 + $0x40] sm:$0xff]  ;;  %v196_v9 = vsub.f32 1.0, %v195_v4  ;;  %v278_v26 = vld [vmem:[%s533_s2 + $0x70] ss:$0 sm:$0xff] }
  0x1b   :  { %89 = vmatpush.msra.mxu1 %v41_v27  ;;  %168 = vmatpush.msra.mxu3 %v107_v47  ;;  %v277_v62 = vld [vmem:[%s533_s2 + $0x68] ss:$0 sm:$0xff] }
  0x1c   :  { %67 = vmatpush.msra.mxu0 %v24_v28  ;;  %222 = vmatpush.msrb.mxu2 %v113_v57  ;;  %v197_v13 = vmul.f32 %v280_v1, %v196_v9 }
  0x1d   :  { %90 = vmatpush.msra.mxu1 %v40_v29  ;;  %169 = vmatpush.msra.mxu3 %v106_v48 }
  0x1e   :  { %68 = vmatpush.msra.mxu0 %v23_v30  ;;  %223 = vmatpush.msrb.mxu2 %v112_v58  ;;  %v198_v17 = vadd.f32 %v280_v1, %v197_v13 }
  0x1f   :  { %91 = vmatpush.msra.mxu1 %v39_v31  ;;  %170 = vmatpush.msra.mxu3 %v105_v49 }
  0x20   :  { %69 = vmatpush.msra.mxu0 %v22_v32  ;;  %224 = vmatpush.msrb.mxu2 %v111_v59  ;;  %v200_v21 = vsel %vm199_vm1, %v280_v1, %v198_v17 }
  0x21   :  { %92 = vmatpush.msra.mxu1 %v38_v33  ;;  %70 = vmatmul.f32.vlgmr.msra.gmra.mxu0 %v18_v34 }
  0x22   :  { %93 = vmatmul.f32.vlgmr.msra.gmra.mxu1 %v19_v35  ;;  %225 = vmatpush.msrb.mxu2 %v110_v60 }
  0x29   :  { %73 = vmatmul.f32.gmra.mxu0 %v20_v36 }
  0x2a   :  { %96 = vmatmul.f32.gmra.mxu1 %v21_v37 }
  0x9e   :  { %v71_v41 = vpop.f32.mrf.mxu0 }
  0x9f   :  { %v94_v42 = vpop.f32.mrf.mxu1 }
  0xa0   :  { %v95_v43 = vadd.f32 %v94_v42, %v71_v41 }
  0xa2   :  { %266 = vmatmul.msk.f32.vlgmr.msra.gmra.mxu2 %vm116_vm0, %v95_v43 }
  0xa6   :  { %v74_v44 = vpop.f32.mrf.mxu0 }
  0xa7   :  { %v97_v45 = vpop.f32.mrf.mxu1 }
  0xa8   :  { %v98_v46 = vadd.f32 %v97_v45, %v74_v44 }
  0xaa   :  { %267 = vmatmul.msk.f32.gmra.mxu2 %vm116_vm0, %v98_v46 }
 0x125   :  { %v140_v51 = vpop.f32.mrf.mxu2 }
 0x126   :  { %v141_v52 = vadd.f32 %v276_v50, %v140_v51 }
 0x128   :  { %v146_v53 = vmax.f32 %v141_v52, 0.0 }
 0x12a   :  { %268 = vmatmul.msk.f32.vlgmr.msra.gmra.mxu3 %vm116_vm0, %v146_v53 }
 0x12d   :  { %v143_v54 = vpop.f32.mrf.mxu2 }
 0x12e   :  { %v144_v55 = vadd.f32 %v276_v50, %v143_v54 }
 0x130   :  { %v147_v56 = vmax.f32 %v144_v55, 0.0 }
 0x132   :  { %269 = vmatmul.msk.f32.gmra.mxu3 %vm116_vm0, %v147_v56 }
 0x1ad   :  { %v172_v63 = vpop.f32.mrf.mxu3 }
 0x1ae   :  { %v173_v0 = vadd.f32 %v277_v62, %v172_v63 }
 0x1b0   :  { %178 = vst.msk [vmem:[#allocation2] sm:$0xff] %vm116_vm0, %v173_v0  ;;  %v180_v2 = vsel %vm116_vm0, %v173_v0, 0.0 }
 0x1b1   :  { %v181_v3 = vrot.slane %v180_v2, 4 }
 0x1b3   :  { %v182_v5 = vadd.f32 %v181_v3, %v180_v2 }
 0x1b5   :  { %v183_v6 = vrot.slane %v182_v5, 2  ;;  %v175_v7 = vpop.f32.mrf.mxu3 }
 0x1b6   :  { %v176_v8 = vadd.f32 %v277_v62, %v175_v7 }
 0x1b7   :  { %v184_v11 = vadd.f32 %v183_v6, %v182_v5 }
 0x1b8   :  { %179 = vst.msk [vmem:[#allocation2 + $0x8] sm:$0xff] %vm116_vm0, %v176_v8  ;;  %v187_v10 = vsel %vm116_vm0, %v176_v8, 0.0 }
 0x1b9   :  { %v188_v12 = vrot.slane %v187_v10, 4  ;;  %v185_v15 = vrot.slane %v184_v11, 1  ;;  %244 = dma.vmem_to_hbm [thread:$0]  %s237_s10, 256, %s239_s12, [#allocation3], %s335_s13, %s335_s13, %s336_s14  }
 0x1bb   :  { %v189_v14 = vadd.f32 %v188_v12, %v187_v10  ;;  %v186_v19 = vadd.f32 %v185_v15, %v184_v11 }
 0x1bd   :  { %v190_v16 = vrot.slane %v189_v14, 2  ;;  %v201_v23 = vmul.f32 %v200_v21, %v186_v19 }
 0x1bf   :  { %v191_v18 = vadd.f32 %v190_v16, %v189_v14 }
 0x1c1   :  { %v192_v20 = vrot.slane %v191_v18, 1 }
 0x1c3   :  { %v193_v22 = vadd.f32 %v192_v20, %v191_v18 }
 0x1c5   :  { %v202_v24 = vmul.f32 %v200_v21, %v193_v22 }
 0x1c7   :  { %v207_v25 = vsel %vm206_vm2, %v202_v24, %v201_v23 }
 0x1c8   :  { %270 = vmatmul.msk.f32.vlgmr.msrb.gmra.mxu2 %vm116_vm0, %v207_v25 }
 0x24b   :  { %v227_v27 = vpop.f32.mrf.mxu2 }
 0x24c   :  { %v228_v28 = vadd.f32 %v278_v26, %v227_v27 }
 0x24e   :  { %231 = vst.msk [vmem:[#allocation4] sm:$0x3] %vm230_vm3, %v228_v28 }
 0x24f   :  { %255 = dma.vmem_to_hbm [thread:$0]  %s251_s1, 32, %s253_s20, [#allocation5]  }
 0x250   :  { %329 = dma.done.wait [#allocation3], 256  }
 0x251   :  { %330 = vsyncadd [#allocation3], 4294967040 }
 0x252   :  { %331 = dma.done.wait [#allocation5], 32  }
 0x253   :  { %332 = vsyncadd [#allocation5], 4294967264 }
 0x254   :  { %264 = vsyncpa [#allocation3], 1 }
 0x255   :  { %265 = vsyncpa [#allocation5], 1 }

</bundles_post_ra>
